<compile_context>
chip_gen: v5e
topology: v5e:2x2
jax: 0.10.0
libtpu: 0.0.40
codegen_flags: <defaults>
</compile_context>

<pallas_src>
import functools

import jax
import jax.numpy as jnp
from jax.experimental import pallas as pl
from jax.experimental.pallas import tpu as pltpu

HIDDEN = 64            # fixed by the PyTorch module
PACKED = 2 * HIDDEN    # 128 lanes: [actor hidden | critic hidden]


def _round_up(v, m):
    return ((v + m - 1) // m) * m


def _policy_kernel(x_ref, p_ref, out_ref):
    # Static offsets into the packed parameter slab (8-row aligned segments).
    Sp = x_ref.shape[-1]            # feature dim, already padded to 8-multiple
    o_b1 = Sp
    o_w2 = Sp + 8
    o_b2 = o_w2 + PACKED
    o_w3 = o_b2 + 8
    o_b3 = o_w3 + PACKED

    f32 = jnp.float32
    bf16 = jnp.bfloat16

    # bf16 MXU operands (native fast path on v5e/v6e/v7x), f32 accumulation.
    x = x_ref[...].astype(bf16)                       # (tb, Sp) bf16
    w1 = p_ref[0:Sp, :]                               # (Sp, 128) bf16
    b1 = p_ref[o_b1:o_b1 + 1, :].astype(f32)          # (1, 128)  f32
    w2 = p_ref[o_w2:o_w2 + PACKED, :]                 # (128, 128) bf16, block-diag
    b2 = p_ref[o_b2:o_b2 + 1, :].astype(f32)
    w3 = p_ref[o_w3:o_w3 + PACKED, :]                 # (128, 128) bf16, block-diag
    b3 = p_ref[o_b3:o_b3 + 1, :].astype(f32)

    # Fused actor+critic MLP: 3 MXU passes; bias-add + tanh kept in f32,
    # re-cast to bf16 only at the next dot boundary (v5e-friendly).
    h = jnp.tanh(jnp.dot(x, w1, preferred_element_type=f32) + b1)
    h = jnp.tanh(jnp.dot(h.astype(bf16), w2, preferred_element_type=f32) + b2)
    out = jnp.dot(h.astype(bf16), w3, preferred_element_type=f32) + b3

    # Lane-dense output slab: lanes 0:A = action mean, lane A = estimate.
    out_ref[...] = out.astype(out_ref.dtype)


def pack_params(params, state_space, action_space):
    """Pack all Linear weights/biases into one (rows, 128) bf16 slab."""
    S, A = state_space, action_space
    assert A + 1 <= PACKED, "action_space + 1 must fit in 128 lanes"
    Sp = _round_up(S, 8)
    rows = Sp + 8 + PACKED + 8 + PACKED + 8
    f32 = jnp.float32

    w1 = jnp.concatenate([params["w1a"], params["w1c"]], axis=1)       # (S, 128)
    b1 = jnp.concatenate([params["b1a"], params["b1c"]], axis=1)[0]    # (128,)

    w2 = jnp.zeros((PACKED, PACKED), f32)
    w2 = w2.at[:HIDDEN, :HIDDEN].set(params["w2a"])
    w2 = w2.at[HIDDEN:, HIDDEN:].set(params["w2c"])
    b2 = jnp.concatenate([params["b2a"], params["b2c"]], axis=1)[0]

    w3 = jnp.zeros((PACKED, PACKED), f32)
    w3 = w3.at[:HIDDEN, :A].set(params["w3a"])
    w3 = w3.at[HIDDEN:, A:A + 1].set(params["w3c"])
    b3 = jnp.zeros((PACKED,), f32)
    b3 = b3.at[:A].set(params["b3a"][0])
    b3 = b3.at[A].set(params["b3c"][0, 0])

    slab = jnp.zeros((rows, PACKED), f32)
    slab = slab.at[0:S, :].set(w1)                     # rows S:Sp stay zero
    slab = slab.at[Sp, :].set(b1)
    slab = slab.at[Sp + 8:Sp + 8 + PACKED, :].set(w2)
    slab = slab.at[Sp + 8 + PACKED, :].set(b2)
    slab = slab.at[Sp + 16 + PACKED:Sp + 16 + 2 * PACKED, :].set(w3)
    slab = slab.at[Sp + 16 + 2 * PACKED, :].set(b3)
    # bf16 storage: halves param DMA and feeds the MXU its native operand type.
    return slab.astype(jnp.bfloat16)


@functools.partial(
    jax.jit, static_argnames=("action_space", "block_rows", "return_packed"))
def policy_forward(x, param_slab, sigma_param, action_space,
                   block_rows=2048, return_packed=False):
    """x: (B, state_space) float.  Returns (action_mean, sigma, estimate),
    or (packed_out, sigma) if return_packed=True (avoids the extra HBM pass
    of slicing the (B, 128) slab when the consumer can take it packed)."""
    B, S = x.shape
    A = action_space
    Sp = _round_up(S, 8)
    if Sp != S:
        # Pad the feature dim so the first matmul's K is 8-aligned; the extra
        # slab rows are zero so the result is unchanged.
        x = jnp.pad(x, ((0, 0), (0, Sp - S)))

    # Batch tile: multiple of 8 sublanes, large by default (per-step overhead
    # ~0.35 us; even tb=2048 is only a few MB of double-buffered VMEM, far
    # under every generation's limit).  When the batch spans >1 tile of 8,
    # cap tb so the grid has >= 2 steps and both v7x TensorCores are used.
    Bp8 = _round_up(B, 8)
    tb = min(_round_up(block_rows, 8), Bp8)
    if Bp8 > 8:
        tb = min(tb, _round_up(pl.cdiv(B, 2), 8))
    tb = max(tb, 8)
    grid = (pl.cdiv(B, tb),)

    rows = param_slab.shape[0]
    slab_bytes = rows * PACKED * param_slab.dtype.itemsize
    cost = pl.CostEstimate(
        flops=2 * B * (Sp * PACKED + 2 * PACKED * PACKED),
        transcendentals=2 * B * PACKED,
        bytes_accessed=B * Sp * x.dtype.itemsize + B * PACKED * 4 + slab_bytes,
    )

    out = pl.pallas_call(
        _policy_kernel,
        grid=grid,
        in_specs=[
            pl.BlockSpec((tb, Sp), lambda i: (i, 0)),          # x tile
            pl.BlockSpec((rows, PACKED), lambda i: (0, 0)),    # packed params
        ],
        out_specs=pl.BlockSpec((tb, PACKED), lambda i: (i, 0)),
        out_shape=jax.ShapeDtypeStruct((B, PACKED), jnp.float32),
        compiler_params=pltpu.CompilerParams(
            dimension_semantics=("parallel",)),                # megacore shard
        cost_estimate=cost,
    )(x, param_slab)

    # softplus(sigma) depends only on params -> stable form in the wrapper.
    sigma = jax.nn.softplus(sigma_param.astype(jnp.float32))

    if return_packed:
        return out, sigma
    action_mean = out[:, :A]
    estimate = out[:, A:A + 1]
    return action_mean, sigma, estimate


def init_params(key, state_space, action_space, hidden=HIDDEN):
    """Deterministic init matching the PyTorch module:
       weights ~ Normal(0,1), biases = 0, sigma = 0.5.
       Weights are stored as (in, out) = PyTorch (out, in) transposed."""
    ks = jax.random.split(key, 6)
    f32 = jnp.float32
    return {
        "w1a": jax.random.normal(ks[0], (state_space, hidden), f32),
        "b1a": jnp.zeros((1, hidden), f32),
        "w2a": jax.random.normal(ks[1], (hidden, hidden), f32),
        "b2a": jnp.zeros((1, hidden), f32),
        "w3a": jax.random.normal(ks[2], (hidden, action_space), f32),
        "b3a": jnp.zeros((1, action_space), f32),
        "sigma": jnp.full((action_space,), 0.5, f32),
        "w1c": jax.random.normal(ks[3], (state_space, hidden), f32),
        "b1c": jnp.zeros((1, hidden), f32),
        "w2c": jax.random.normal(ks[4], (hidden, hidden), f32),
        "b2c": jnp.zeros((1, hidden), f32),
        "w3c": jax.random.normal(ks[5], (hidden, 1), f32),
        "b3c": jnp.zeros((1, 1), f32),
    }


def _reference_forward_bf16(x, p):
    """Pure-JAX reference that mirrors the kernel's numerics: bf16 matmul
    operands, f32 accumulation, f32 bias-add and tanh."""
    bf16, f32 = jnp.bfloat16, jnp.float32

    def lin(h, w, b):
        acc = jnp.dot(h.astype(bf16), w.astype(bf16), preferred_element_type=f32)
        return acc + b.astype(bf16).astype(f32)

    ha = jnp.tanh(lin(x, p["w1a"], p["b1a"]))
    ha = jnp.tanh(lin(ha, p["w2a"], p["b2a"]))
    mean = lin(ha, p["w3a"], p["b3a"])
    hc = jnp.tanh(lin(x, p["w1c"], p["b1c"]))
    hc = jnp.tanh(lin(hc, p["w2c"], p["b2c"]))
    est = lin(hc, p["w3c"], p["b3c"])
    sigma = jax.nn.softplus(p["sigma"])
    return mean, sigma, est


if __name__ == "__main__":
    state_space = 8
    action_space = 4
    batch = 2

    key = jax.random.PRNGKey(0)
    k_x, k_p = jax.random.split(key)

    x = jax.random.normal(k_x, (batch, state_space), jnp.float32)
    params = init_params(k_p, state_space, action_space)

    # Pack once (re-pack only after a parameter update).
    slab = pack_params(params, state_space, action_space)

    mean, sigma, est = policy_forward(x, slab, params["sigma"], action_space)
    jax.block_until_ready((mean, sigma, est))

    # Correctness check against a bf16-matched pure-JAX reference (the kernel
    # uses bf16 MXU operands with f32 accumulation, so an exact f32 reference
    # would need a much looser tolerance).
    mean_ref, sigma_ref, est_ref = _reference_forward_bf16(x, params)
    assert mean.shape == (batch, action_space)
    assert est.shape == (batch, 1)
    assert jnp.allclose(mean, mean_ref, atol=1e-1, rtol=5e-2), (
        jnp.max(jnp.abs(mean - mean_ref)))
    assert jnp.allclose(est, est_ref, atol=1e-1, rtol=5e-2), (
        jnp.max(jnp.abs(est - est_ref)))
    assert jnp.allclose(sigma, sigma_ref, atol=1e-6, rtol=1e-6)

    # Normal(action_mean, sigma) would be constructed from (mean, sigma) here;
    # the distribution object itself is not a tensor and stays outside the kernel.
    print("KERNEL_OK")
</pallas_src>

<mosaic_0001>
module attributes {stable_mosaic.version = 11 : i64} {
  func.func @_policy_kernel(%arg0: i32, %arg1: memref<8x8xf32, #tpu.memory_space<vmem>>, %arg2: memref<288x128xbf16, #tpu.memory_space<vmem>>, %arg3: memref<8x128xf32, #tpu.memory_space<vmem>>) attributes {dimension_semantics = [#tpu.dimension_semantics<parallel>], iteration_bounds = array<i64: 1>, scalar_prefetch = 0 : i64, scratch_operands = 0 : i64, tpu.core_type = #tpu.core_type<tc>, window_params = [{transform_indices = @transform_0, window_bounds = array<i64: 8, 8>}, {pipeline_mode = #tpu.pipeline_mode<synchronous>, transform_indices = @transform_1, window_bounds = array<i64: 288, 128>}, {transform_indices = @transform_2, window_bounds = array<i64: 8, 128>}]} {
    %c0 = arith.constant 0 : index
    %c0_0 = arith.constant 0 : index
    %0 = vector.load %arg1[%c0, %c0_0] : memref<8x8xf32, #tpu.memory_space<vmem>>, vector<8x8xf32>
    %1 = arith.truncf %0 : vector<8x8xf32> to vector<8x8xbf16>
    %c0_1 = arith.constant 0 : index
    %c0_2 = arith.constant 0 : index
    %2 = vector.load %arg2[%c0_1, %c0_2] : memref<288x128xbf16, #tpu.memory_space<vmem>>, vector<8x128xbf16>
    %c8 = arith.constant 8 : index
    %c0_3 = arith.constant 0 : index
    %3 = vector.load %arg2[%c8, %c0_3] : memref<288x128xbf16, #tpu.memory_space<vmem>>, vector<1x128xbf16>
    %4 = arith.extf %3 : vector<1x128xbf16> to vector<1x128xf32>
    %c16 = arith.constant 16 : index
    %c0_4 = arith.constant 0 : index
    %5 = vector.load %arg2[%c16, %c0_4] : memref<288x128xbf16, #tpu.memory_space<vmem>>, vector<128x128xbf16>
    %c144 = arith.constant 144 : index
    %c0_5 = arith.constant 0 : index
    %6 = vector.load %arg2[%c144, %c0_5] : memref<288x128xbf16, #tpu.memory_space<vmem>>, vector<1x128xbf16>
    %7 = arith.extf %6 : vector<1x128xbf16> to vector<1x128xf32>
    %c152 = arith.constant 152 : index
    %c0_6 = arith.constant 0 : index
    %8 = vector.load %arg2[%c152, %c0_6] : memref<288x128xbf16, #tpu.memory_space<vmem>>, vector<128x128xbf16>
    %c280 = arith.constant 280 : index
    %c0_7 = arith.constant 0 : index
    %9 = vector.load %arg2[%c280, %c0_7] : memref<288x128xbf16, #tpu.memory_space<vmem>>, vector<1x128xbf16>
    %10 = arith.extf %9 : vector<1x128xbf16> to vector<1x128xf32>
    %cst = arith.constant dense<0.000000e+00> : vector<8x128xf32>
    %11 = tpu.matmul %1, %2, %cst {dimension_numbers = #tpu.dot_dimension_numbers<[1], [0], [0], [1], [0, 0, 1, 1], [], []>} : vector<8x8xbf16>, vector<8x128xbf16>, vector<8x128xf32> -> vector<8x128xf32>
    %12 = vector.broadcast %4 : vector<1x128xf32> to vector<8x128xf32>
    %13 = arith.addf %11, %12 : vector<8x128xf32>
    %14 = math.tanh %13 : vector<8x128xf32>
    %15 = arith.truncf %14 : vector<8x128xf32> to vector<8x128xbf16>
    %cst_8 = arith.constant dense<0.000000e+00> : vector<8x128xf32>
    %16 = tpu.matmul %15, %5, %cst_8 {dimension_numbers = #tpu.dot_dimension_numbers<[1], [0], [0], [1], [0, 0, 1, 1], [], []>} : vector<8x128xbf16>, vector<128x128xbf16>, vector<8x128xf32> -> vector<8x128xf32>
    %17 = vector.broadcast %7 : vector<1x128xf32> to vector<8x128xf32>
    %18 = arith.addf %16, %17 : vector<8x128xf32>
    %19 = math.tanh %18 : vector<8x128xf32>
    %20 = arith.truncf %19 : vector<8x128xf32> to vector<8x128xbf16>
    %cst_9 = arith.constant dense<0.000000e+00> : vector<8x128xf32>
    %21 = tpu.matmul %20, %8, %cst_9 {dimension_numbers = #tpu.dot_dimension_numbers<[1], [0], [0], [1], [0, 0, 1, 1], [], []>} : vector<8x128xbf16>, vector<128x128xbf16>, vector<8x128xf32> -> vector<8x128xf32>
    %22 = vector.broadcast %10 : vector<1x128xf32> to vector<8x128xf32>
    %23 = arith.addf %21, %22 : vector<8x128xf32>
    %c0_10 = arith.constant 0 : index
    %c0_11 = arith.constant 0 : index
    %24 = vector.load %arg3[%c0_10, %c0_11] : memref<8x128xf32, #tpu.memory_space<vmem>>, vector<8x128xf32>
    tpu.vector_store %arg3[%c0_10, %c0_11], %23 {strides = array<i32>} : memref<8x128xf32, #tpu.memory_space<vmem>>, vector<8x128xf32>,
    return
  }
  func.func @transform_0(%arg0: i32) -> (i32, i32) {
    %c0_i32 = arith.constant 0 : i32
    %c0_i32_0 = arith.constant 0 : i32
    return %arg0, %c0_i32 : i32, i32
  }
  func.func @transform_1(%arg0: i32) -> (i32, i32) {
    %c0_i32 = arith.constant 0 : i32
    %c0_i32_0 = arith.constant 0 : i32
    %c0_i32_1 = arith.constant 0 : i32
    return %c0_i32, %c0_i32_0 : i32, i32
  }
  func.func @transform_2(%arg0: i32) -> (i32, i32) {
    %c0_i32 = arith.constant 0 : i32
    %c0_i32_0 = arith.constant 0 : i32
    return %arg0, %c0_i32 : i32, i32
  }
}

</mosaic_0001>

<bundles_post_ra>
// kernel: policy_forward.1
= control target key start
LH: loop header
LB: loop body
LE: loop exit
PB: predicated region body
PF: predicated region fallthrough
CT: control target
= control target key end

     0   :  { %7 = vsyncpa [#allocation3], 0  ;;  %s452_s0 = inlined_call_operand.hbm [shape: f32[2,8], index: 0, kind: input, shape index: {}]   ;;  %s453_s1 = inlined_call_operand.hbm [shape: bf16[288,128], index: 1, kind: input, shape index: {}]   ;;  %s454_s2 = inlined_call_operand.vmem [shape: f32[2,128], index: 2, kind: output, shape index: {}]  }
   0x1   :  { %8 = vsyncpa [#allocation5], 0 }
   0x2   :  { %12 = vsyncadd [#allocation3], 96  ;;  %s13_s11 = sshll.u32 %s452_s0, 4  ;;  %s422_s12 = smov [#allocation2]   ;;  %s14_s11 = int_to_ptr.hbm [resolvable:$true] %s13_s11 }
   0x3   :  { %s15_s13 = sshll.u32 %s422_s12, 4  ;;  %s26_s16 = sshll.u32 %s453_s1, 4  ;;  %s16_s13 = int_to_ptr.vmem [resolvable:$true] %s15_s13  ;;  %s27_s16 = int_to_ptr.hbm [resolvable:$true] %s26_s16 }
   0x4   :  { %s423_s17 = smov 32   ;;  %s424_s18 = smov 2  }
   0x5   :  { %21 = dma.hbm_to_vmem [thread:$0]  %s14_s11, 32, %s16_s13, [#allocation3], %s423_s17, %s423_s17, %s424_s18  }
   0x6   :  { %s425_s19 = smov [#allocation4]   ;;  %s426_s21 = smov 64  }
   0x7   :  { %s28_s20 = sshll.u32 %s425_s19, 4  ;;  %s427_s22 = smov 4   ;;  %s29_s20 = int_to_ptr.vmem [resolvable:$true] %s28_s20 }
   0x8   :  { %34 = dma.hbm_to_vmem [thread:$0]  %s27_s16, 2304, %s29_s20, [#allocation5], %s426_s21, %s426_s21, %s427_s22  }
   0x9   :  { %418 = dma.done.wait [#allocation3], 128  }
   0xa   :  { %419 = vsyncadd [#allocation3], 4294967168 }
   0xb   :  { %420 = dma.done.wait [#allocation5], 2304  }
   0xc   :  { %421 = vsyncadd [#allocation5], 4294964992  ;;  %vm90_vm0 = vcmask 1043456   ;;  %v46_v0 = vld [vmem:[#allocation4] sm:$0xf]  ;;  %v44_v1 = vld [vmem:[#allocation2] sm:$0xff] }
   0xd   :  { %v351_v2 = vld [vmem:[#allocation4 + $0x40] sm:$0xff]  ;;  %v92_v3 = vsel %vm90_vm0, %v46_v0, 0  ;;  %v45_v4 = vpack.c.bf16 %v44_v1, %v44_v1  ;;  %vm86_vm1 = vcmask 64512   ;;  %v350_v5 = vld [vmem:[#allocation4 + $0x38] sm:$0xff]  ;;  %v349_v6 = vld [vmem:[#allocation4 + $0x30] sm:$0xff] }
   0xe   :  { %101 = vmatpush.bf16.msra.mxu0 %v92_v3  ;;  %158 = vmatpush.bf16.msra.mxu1 %v351_v2  ;;  %v348_v7 = vld [vmem:[#allocation4 + $0x28] sm:$0xff]  ;;  %v347_v8 = vld [vmem:[#allocation4 + $0x20] sm:$0xff]  ;;  %v346_v9 = vld [vmem:[#allocation4 + $0x18] sm:$0xff] }
   0xf   :  { %v345_v10 = vld [vmem:[#allocation4 + $0x10] sm:$0xff]  ;;  %v344_v11 = vld [vmem:[#allocation4 + $0x8] sm:$0xff]  ;;  %v358_v13 = vld [vmem:[#allocation4 + $0x7c] sm:$0xff] }
  0x10   :  { %v359_v12 = vld [vmem:[#allocation4 + $0x84] sm:$0xff]  ;;  %v357_v14 = vld [vmem:[#allocation4 + $0x74] sm:$0xff]  ;;  %v356_v16 = vld [vmem:[#allocation4 + $0x6c] sm:$0xff] }
  0x11   :  { %279 = vmatmul.msk.bf16.vlgmr.msra.gmra.mxu0 %vm86_vm1, %v45_v4  ;;  %222 = vmatpush.bf16.msra.mxu2 %v359_v12  ;;  %v47_v15 = vld [vmem:[#allocation4 + $0x4] sm:$0x1]  ;;  %v354_v25 = vld [vmem:[#allocation4 + $0x5c] sm:$0xff]  ;;  %v353_v26 = vld [vmem:[#allocation4 + $0x54] sm:$0xff] }
  0x12   :  { %159 = vmatpush.bf16.msra.mxu1 %v350_v5  ;;  %v48_v17 = vunpack.c.l.bf16 %v47_v15  ;;  %v355_v18 = vld [vmem:[#allocation4 + $0x64] sm:$0xff]  ;;  %v352_v27 = vld [vmem:[#allocation4 + $0x4c] sm:$0xff] }
  0x13   :  { %v65_v28 = vld [vmem:[#allocation4 + $0x48] sm:$0x1]  ;;  %v83_v36 = vld [vmem:[#allocation4 + $0x8c] sm:$0x1] }
  0x14   :  { %v85_v19 = vperm.slane %v48_v17, 0  ;;  %v66_v29 = vunpack.c.l.bf16 %v65_v28  ;;  %v84_v37 = vunpack.c.l.bf16 %v83_v36 }
  0x15   :  { %223 = vmatpush.bf16.msra.mxu2 %v358_v13 }
  0x16   :  { %160 = vmatpush.bf16.msra.mxu1 %v349_v6  ;;  %v109_v30 = vperm.slane %v66_v29, 0  ;;  %v173_v38 = vperm.slane %v84_v37, 0 }
  0x19   :  { %224 = vmatpush.bf16.msra.mxu2 %v357_v14 }
  0x1a   :  { %161 = vmatpush.bf16.msra.mxu1 %v348_v7 }
  0x1d   :  { %225 = vmatpush.bf16.msra.mxu2 %v356_v16 }
  0x1e   :  { %162 = vmatpush.bf16.msra.mxu1 %v347_v8 }
  0x21   :  { %226 = vmatpush.bf16.msra.mxu2 %v355_v18 }
  0x22   :  { %163 = vmatpush.bf16.msra.mxu1 %v346_v9 }
  0x25   :  { %227 = vmatpush.bf16.msra.mxu2 %v354_v25 }
  0x26   :  { %164 = vmatpush.bf16.msra.mxu1 %v345_v10 }
  0x29   :  { %228 = vmatpush.bf16.msra.mxu2 %v353_v26 }
  0x2a   :  { %165 = vmatpush.bf16.msra.mxu1 %v344_v11 }
  0x2d   :  { %229 = vmatpush.bf16.msra.mxu2 %v352_v27 }
  0x8e   :  { %v103_v20 = vpop.f32.mrf.mxu0 }
  0x8f   :  { %v104_v21 = vadd.f32 %v103_v20, %v85_v19 }
  0x91   :  { %366 = vtanh.f32 %v104_v21 }
  0x96   :  { %v105_v22 = vpop.f32.mrf.mxu0 }
  0x97   :  { %v367_v23 = vpop.eup %366 }
  0x98   :  { %v108_v24 = vpack.c.bf16 %v367_v23, %v367_v23 }
  0x9a   :  { %166 = vmatmul.bf16.vlgmr.msra.gmra.mxu1 %v108_v24 }
 0x117   :  { %v167_v31 = vpop.f32.mrf.mxu1 }
 0x118   :  { %v168_v32 = vadd.f32 %v167_v31, %v109_v30 }
 0x11a   :  { %368 = vtanh.f32 %v168_v32 }
 0x11f   :  { %v169_v33 = vpop.f32.mrf.mxu1 }
 0x120   :  { %v369_v34 = vpop.eup %368 }
 0x121   :  { %v172_v35 = vpack.c.bf16 %v369_v34, %v369_v34 }
 0x123   :  { %230 = vmatmul.bf16.vlgmr.msra.gmra.mxu2 %v172_v35 }
 0x1a6   :  { %v231_v39 = vpop.f32.mrf.mxu2 }
 0x1a7   :  { %v232_v40 = vadd.f32 %v231_v39, %v173_v38 }
 0x1a9   :  { %235 = vst [vmem:[#allocation6] sm:$0xff] %v232_v40 }
 0x1ae   :  { %v233_v41 = vpop.f32.mrf.mxu2 }
 0x1b0   :  { %v254_v42 = vld [vmem:[#allocation6] sm:$0x3] }
 0x1b1   :  { %255 = vst [vmem:[%s454_s2] sm:$0x3] %v254_v42 }
 0x1b2   :  { %273 = vsyncpa [#allocation3], 1 }
 0x1b3   :  { %274 = vsyncpa [#allocation5], 1 }

</bundles_post_ra>
